<compile_context>
chip_gen: v6e
topology: v6e:2x2x1
jax: 0.10.0
libtpu: 0.0.40
codegen_flags: <defaults>
</compile_context>

<pallas_src>
import functools

import jax
import jax.numpy as jnp
from jax import lax
from jax.experimental import pallas as pl
from jax.experimental.pallas import tpu as pltpu


def _round_up(x, m):
    return (x + m - 1) // m * m


def pad_embedding_table(table):
    """Pad the (V, V) embedding table on the lane axis to (V, Vp), Vp = roundup(V, 128).

    Pad columns are filled with -1e30 so the in-kernel logsumexp needs no lane mask.
    Call ONCE at parameter-init time (hoisted out of the forward pass).
    """
    v_rows, v_cols = table.shape
    vp = _round_up(v_cols, 128)
    table = table.astype(jnp.float32)
    if vp > v_cols:
        table = jnp.pad(table, ((0, 0), (0, vp - v_cols)), constant_values=-1e30)
    return table
    # TODO(synk): for vocabularies whose padded table exceeds ~16 MiB (v7x VMEM budget),
    # switch to an HBM-resident table (memory_space=pl.ANY) with per-block row DMAs.


def _gather_rows(idx_ref, tab_ref, dst_ref, base):
    """Gather dst_ref[r, :] = tab_ref[idx_ref[base + r], :] for r in [0, R).

    idx_ref: (N_pad,) int32 in SMEM (scalar prefetch).
    tab_ref: (V, Vp) f32 VMEM-resident table.
    dst_ref: (R, Vp) f32 VMEM block (pipelined output block or scratch), R % 8 == 0.
    """
    r_block = dst_ref.shape[0]
    assert r_block % 8 == 0

    def body(r8, carry):
        r0 = r8 * 8
        # Manual 8x unroll inside the fori_loop body (keeps loop overhead low without
        # relying on unroll kwargs; iterations are independent vreg load/stores).
        for u in range(8):
            r = r0 + u
            tok = idx_ref[base + r]
            dst_ref[pl.ds(r, 1), :] = tab_ref[pl.ds(tok, 1), :]
        return carry

    lax.fori_loop(0, r_block // 8, body, 0)


def _gather_kernel(idx_ref, tab_ref, logits_ref):
    # No-targets path: just the embedding lookup for an R-row block.
    r_block = logits_ref.shape[0]
    base = pl.program_id(0) * r_block
    _gather_rows(idx_ref, tab_ref, logits_ref, base)


def _ce_body(n_valid, idx_ref, tgt_ref, tab_ref, blk_ref, loss_ref):
    """Shared gather + per-block cross-entropy partial sum.

    n_valid: static python int = true number of rows N (rows >= N are padding).
    tgt_ref: (R, 1) int32 targets block.
    blk_ref: (R, Vp) f32 destination for gathered rows (output block or VMEM scratch).
    loss_ref: (1, 1) f32 per-block sum of per-row losses.
    """
    r_block, vp = blk_ref.shape
    base = pl.program_id(0) * r_block

    _gather_rows(idx_ref, tab_ref, blk_ref, base)

    blk = blk_ref[...]  # (R, Vp); pad lanes already hold -1e30 (baked into the table)

    # logsumexp over the lane (class) axis; pad lanes underflow to 0 in exp.
    row_max = jnp.max(blk, axis=-1, keepdims=True)                       # (R, 1)
    lse = jnp.log(jnp.sum(jnp.exp(blk - row_max), axis=-1, keepdims=True)) + row_max

    # Target logit pick: single lane-iota compare (targets are always < V, i.e. real lanes).
    lane = lax.broadcasted_iota(jnp.int32, (r_block, vp), 1)
    tgt = tgt_ref[...]                                                   # (R, 1) int32
    tgt_logit = jnp.sum(jnp.where(lane == tgt, blk, 0.0), axis=-1, keepdims=True)

    # Mask rows past the true N (row padding uses token id 0, a valid table row).
    row_id = lax.broadcasted_iota(jnp.int32, (r_block, 1), 0) + base
    per_row = jnp.where(row_id < n_valid, lse - tgt_logit, 0.0)

    loss_ref[...] = jnp.sum(per_row, keepdims=True)                      # (1, 1)


def _gather_ce_kernel(n_valid, idx_ref, tgt_ref, tab_ref, logits_ref, loss_ref):
    _ce_body(n_valid, idx_ref, tgt_ref, tab_ref, logits_ref, loss_ref)


def _ce_loss_only_kernel(n_valid, idx_ref, tgt_ref, tab_ref, loss_ref, blk_scratch):
    _ce_body(n_valid, idx_ref, tgt_ref, tab_ref, blk_scratch, loss_ref)


def bigram_forward(idx, table_padded, vocab_size, targets=None, loss_only=False):
    """Mirrors BigramLanguageModel.forward.

    Args:
      idx:          (B, T) int token ids.
      table_padded: (V, Vp) f32 table from pad_embedding_table (padding done once at init).
      vocab_size:   V (true vocabulary size).
      targets:      optional (B, T) int targets.
      loss_only:    if True (and targets given), skip the logits HBM writeback.

    Returns (logits, loss):
      - targets is None : logits (B, T, V), loss None
      - targets given   : logits (B*T, V) (or None if loss_only), loss scalar (mean CE)
    """
    B, T = idx.shape
    V = vocab_size
    Vt, Vp = table_padded.shape
    N = B * T

    # Row-block size: multiple of 8, up to 128; pad N up to a whole number of blocks.
    R = min(128, _round_up(N, 8))
    N_pad = _round_up(N, R)
    G = N_pad // R

    idx_flat = idx.reshape(N).astype(jnp.int32)
    if N_pad > N:
        idx_flat = jnp.pad(idx_flat, (0, N_pad - N))  # pad with token 0 (valid table row)

    compiler_params = pltpu.CompilerParams(
        dimension_semantics=("parallel",),      # row blocks are independent (v7x megacore)
        vmem_limit_bytes=32 * 1024 * 1024,      # resident table + R-row blocks; fits v7x
    )

    table_spec = pl.BlockSpec((Vt, Vp), lambda i, ids: (0, 0))   # constant -> fetched once
    logits_spec = pl.BlockSpec((R, Vp), lambda i, ids: (i, 0))   # lane/sublane-dense stores

    if targets is None:
        grid_spec = pltpu.PrefetchScalarGridSpec(
            num_scalar_prefetch=1,
            grid=(G,),
            in_specs=[table_spec],
            out_specs=logits_spec,
        )
        logits_p = pl.pallas_call(
            _gather_kernel,
            out_shape=jax.ShapeDtypeStruct((N_pad, Vp), jnp.float32),
            grid_spec=grid_spec,
            compiler_params=compiler_params,
        )(idx_flat, table_padded)
        return logits_p[:N, :V].reshape(B, T, V), None

    tgt_col = targets.reshape(N, 1).astype(jnp.int32)
    if N_pad > N:
        tgt_col = jnp.pad(tgt_col, ((0, N_pad - N), (0, 0)))

    tgt_spec = pl.BlockSpec((R, 1), lambda i, ids: (i, 0))
    loss_spec = pl.BlockSpec((1, 1), lambda i, ids: (i, 0))

    if loss_only:
        grid_spec = pltpu.PrefetchScalarGridSpec(
            num_scalar_prefetch=1,
            grid=(G,),
            in_specs=[tgt_spec, table_spec],
            out_specs=loss_spec,
            scratch_shapes=[pltpu.VMEM((R, Vp), jnp.float32)],
        )
        loss_parts = pl.pallas_call(
            functools.partial(_ce_loss_only_kernel, N),
            out_shape=jax.ShapeDtypeStruct((G, 1), jnp.float32),
            grid_spec=grid_spec,
            compiler_params=compiler_params,
        )(idx_flat, tgt_col, table_padded)
        return None, jnp.sum(loss_parts) / N

    grid_spec = pltpu.PrefetchScalarGridSpec(
        num_scalar_prefetch=1,
        grid=(G,),
        in_specs=[tgt_spec, table_spec],
        out_specs=(logits_spec, loss_spec),
    )
    logits_p, loss_parts = pl.pallas_call(
        functools.partial(_gather_ce_kernel, N),
        out_shape=(
            jax.ShapeDtypeStruct((N_pad, Vp), jnp.float32),
            jax.ShapeDtypeStruct((G, 1), jnp.float32),
        ),
        grid_spec=grid_spec,
        compiler_params=compiler_params,
    )(idx_flat, tgt_col, table_padded)

    loss = jnp.sum(loss_parts) / N
    return logits_p[:N, :V], loss


if __name__ == "__main__":
    # Small, deterministic setup (tiny-shakespeare-sized vocab).
    vocab_size = 65
    B, T = 2, 8

    key = jax.random.PRNGKey(0)
    k_tab, k_idx, k_tgt = jax.random.split(key, 3)

    # nn.Embedding default init: N(0, 1)
    table = jax.random.normal(k_tab, (vocab_size, vocab_size), dtype=jnp.float32)
    idx = jax.random.randint(k_idx, (B, T), 0, vocab_size, dtype=jnp.int32)
    targets = jax.random.randint(k_tgt, (B, T), 0, vocab_size, dtype=jnp.int32)

    # Lane-pad (+ bake -1e30 mask) ONCE at init time; never inside the forward pass.
    table_p = pad_embedding_table(table)

    # Path 1: no targets -> (B, T, V) logits, loss None
    logits_no_tgt, loss_none = bigram_forward(idx, table_p, vocab_size)
    jax.block_until_ready(logits_no_tgt)
    assert logits_no_tgt.shape == (B, T, vocab_size)
    assert loss_none is None

    # Path 2: with targets -> (B*T, V) logits, scalar loss
    logits, loss = bigram_forward(idx, table_p, vocab_size, targets=targets)
    jax.block_until_ready((logits, loss))
    assert logits.shape == (B * T, vocab_size)
    assert loss.shape == ()

    # Path 3: loss-only training variant (no logits writeback)
    _, loss_lo = bigram_forward(idx, table_p, vocab_size, targets=targets, loss_only=True)
    jax.block_until_ready(loss_lo)

    # Pure-JAX reference check
    ref_logits = table[idx].reshape(B * T, vocab_size)
    ref_lse = jax.nn.logsumexp(ref_logits, axis=-1)
    ref_loss = jnp.mean(ref_lse - ref_logits[jnp.arange(B * T), targets.reshape(-1)])
    assert jnp.allclose(logits_no_tgt.reshape(B * T, vocab_size), ref_logits, atol=1e-5)
    assert jnp.allclose(logits, ref_logits, atol=1e-5)
    assert jnp.allclose(loss, ref_loss, atol=1e-5)
    assert jnp.allclose(loss_lo, ref_loss, atol=1e-5)

    # TODO(synk): generate() (autoregressive multinomial sampling loop) is host-side
    # control flow, not implemented as a kernel.
    print("KERNEL_OK")
</pallas_src>

<mosaic_0001>
module attributes {stable_mosaic.version = 11 : i64} {
  func.func @_gather_kernel(%arg0: i32, %arg1: memref<16xi32, #tpu.memory_space<smem>>, %arg2: memref<65x128xf32, #tpu.memory_space<vmem>>, %arg3: memref<16x128xf32, #tpu.memory_space<vmem>>) attributes {dimension_semantics = [#tpu.dimension_semantics<parallel>], iteration_bounds = array<i64: 1>, scalar_prefetch = 1 : i64, scratch_operands = 0 : i64, tpu.core_type = #tpu.core_type<tc>, window_params = [{pipeline_mode = #tpu.pipeline_mode<synchronous>, transform_indices = @transform_0, window_bounds = array<i64: 65, 128>}, {transform_indices = @transform_1, window_bounds = array<i64: 16, 128>}]} {
    %c16_i32 = arith.constant 16 : i32
    %0 = arith.muli %arg0, %c16_i32 : i32
    %c0_i32 = arith.constant 0 : i32
    %c2_i32 = arith.constant 2 : i32
    %1 = arith.addi %c0_i32, %c2_i32 : i32
    %c1_i32 = arith.constant 1 : i32
    scf.for %arg4 = %c0_i32 to %1 step %c1_i32  : i32 {
      %c8_i32 = arith.constant 8 : i32
      %2 = arith.muli %arg4, %c8_i32 : i32
      %c0_i32_1 = arith.constant 0 : i32
      %3 = arith.addi %2, %c0_i32_1 : i32
      %4 = arith.addi %0, %3 : i32
      %5 = arith.index_cast %4 : i32 to index
      %6 = memref.load %arg1[%5] : memref<16xi32, #tpu.memory_space<smem>>
      %7 = arith.index_cast %6 : i32 to index
      %c0 = arith.constant 0 : index
      %8 = vector.load %arg2[%7, %c0] : memref<65x128xf32, #tpu.memory_space<vmem>>, vector<1x128xf32>
      %9 = arith.index_cast %3 : i32 to index
      %c0_2 = arith.constant 0 : index
      %10 = vector.load %arg3[%9, %c0_2] : memref<16x128xf32, #tpu.memory_space<vmem>>, vector<1x128xf32>
      tpu.vector_store %arg3[%9, %c0_2], %8 {strides = array<i32>} : memref<16x128xf32, #tpu.memory_space<vmem>>, vector<1x128xf32>,
      %c1_i32_3 = arith.constant 1 : i32
      %11 = arith.addi %2, %c1_i32_3 : i32
      %12 = arith.addi %0, %11 : i32
      %13 = arith.index_cast %12 : i32 to index
      %14 = memref.load %arg1[%13] : memref<16xi32, #tpu.memory_space<smem>>
      %15 = arith.index_cast %14 : i32 to index
      %c0_4 = arith.constant 0 : index
      %16 = vector.load %arg2[%15, %c0_4] : memref<65x128xf32, #tpu.memory_space<vmem>>, vector<1x128xf32>
      %17 = arith.index_cast %11 : i32 to index
      %c0_5 = arith.constant 0 : index
      %18 = vector.load %arg3[%17, %c0_5] : memref<16x128xf32, #tpu.memory_space<vmem>>, vector<1x128xf32>
      tpu.vector_store %arg3[%17, %c0_5], %16 {strides = array<i32>} : memref<16x128xf32, #tpu.memory_space<vmem>>, vector<1x128xf32>,
      %c2_i32_6 = arith.constant 2 : i32
      %19 = arith.addi %2, %c2_i32_6 : i32
      %20 = arith.addi %0, %19 : i32
      %21 = arith.index_cast %20 : i32 to index
      %22 = memref.load %arg1[%21] : memref<16xi32, #tpu.memory_space<smem>>
      %23 = arith.index_cast %22 : i32 to index
      %c0_7 = arith.constant 0 : index
      %24 = vector.load %arg2[%23, %c0_7] : memref<65x128xf32, #tpu.memory_space<vmem>>, vector<1x128xf32>
      %25 = arith.index_cast %19 : i32 to index
      %c0_8 = arith.constant 0 : index
      %26 = vector.load %arg3[%25, %c0_8] : memref<16x128xf32, #tpu.memory_space<vmem>>, vector<1x128xf32>
      tpu.vector_store %arg3[%25, %c0_8], %24 {strides = array<i32>} : memref<16x128xf32, #tpu.memory_space<vmem>>, vector<1x128xf32>,
      %c3_i32 = arith.constant 3 : i32
      %27 = arith.addi %2, %c3_i32 : i32
      %28 = arith.addi %0, %27 : i32
      %29 = arith.index_cast %28 : i32 to index
      %30 = memref.load %arg1[%29] : memref<16xi32, #tpu.memory_space<smem>>
      %31 = arith.index_cast %30 : i32 to index
      %c0_9 = arith.constant 0 : index
      %32 = vector.load %arg2[%31, %c0_9] : memref<65x128xf32, #tpu.memory_space<vmem>>, vector<1x128xf32>
      %33 = arith.index_cast %27 : i32 to index
      %c0_10 = arith.constant 0 : index
      %34 = vector.load %arg3[%33, %c0_10] : memref<16x128xf32, #tpu.memory_space<vmem>>, vector<1x128xf32>
      tpu.vector_store %arg3[%33, %c0_10], %32 {strides = array<i32>} : memref<16x128xf32, #tpu.memory_space<vmem>>, vector<1x128xf32>,
      %c4_i32 = arith.constant 4 : i32
      %35 = arith.addi %2, %c4_i32 : i32
      %36 = arith.addi %0, %35 : i32
      %37 = arith.index_cast %36 : i32 to index
      %38 = memref.load %arg1[%37] : memref<16xi32, #tpu.memory_space<smem>>
      %39 = arith.index_cast %38 : i32 to index
      %c0_11 = arith.constant 0 : index
      %40 = vector.load %arg2[%39, %c0_11] : memref<65x128xf32, #tpu.memory_space<vmem>>, vector<1x128xf32>
      %41 = arith.index_cast %35 : i32 to index
      %c0_12 = arith.constant 0 : index
      %42 = vector.load %arg3[%41, %c0_12] : memref<16x128xf32, #tpu.memory_space<vmem>>, vector<1x128xf32>
      tpu.vector_store %arg3[%41, %c0_12], %40 {strides = array<i32>} : memref<16x128xf32, #tpu.memory_space<vmem>>, vector<1x128xf32>,
      %c5_i32 = arith.constant 5 : i32
      %43 = arith.addi %2, %c5_i32 : i32
      %44 = arith.addi %0, %43 : i32
      %45 = arith.index_cast %44 : i32 to index
      %46 = memref.load %arg1[%45] : memref<16xi32, #tpu.memory_space<smem>>
      %47 = arith.index_cast %46 : i32 to index
      %c0_13 = arith.constant 0 : index
      %48 = vector.load %arg2[%47, %c0_13] : memref<65x128xf32, #tpu.memory_space<vmem>>, vector<1x128xf32>
      %49 = arith.index_cast %43 : i32 to index
      %c0_14 = arith.constant 0 : index
      %50 = vector.load %arg3[%49, %c0_14] : memref<16x128xf32, #tpu.memory_space<vmem>>, vector<1x128xf32>
      tpu.vector_store %arg3[%49, %c0_14], %48 {strides = array<i32>} : memref<16x128xf32, #tpu.memory_space<vmem>>, vector<1x128xf32>,
      %c6_i32 = arith.constant 6 : i32
      %51 = arith.addi %2, %c6_i32 : i32
      %52 = arith.addi %0, %51 : i32
      %53 = arith.index_cast %52 : i32 to index
      %54 = memref.load %arg1[%53] : memref<16xi32, #tpu.memory_space<smem>>
      %55 = arith.index_cast %54 : i32 to index
      %c0_15 = arith.constant 0 : index
      %56 = vector.load %arg2[%55, %c0_15] : memref<65x128xf32, #tpu.memory_space<vmem>>, vector<1x128xf32>
      %57 = arith.index_cast %51 : i32 to index
      %c0_16 = arith.constant 0 : index
      %58 = vector.load %arg3[%57, %c0_16] : memref<16x128xf32, #tpu.memory_space<vmem>>, vector<1x128xf32>
      tpu.vector_store %arg3[%57, %c0_16], %56 {strides = array<i32>} : memref<16x128xf32, #tpu.memory_space<vmem>>, vector<1x128xf32>,
      %c7_i32 = arith.constant 7 : i32
      %59 = arith.addi %2, %c7_i32 : i32
      %60 = arith.addi %0, %59 : i32
      %61 = arith.index_cast %60 : i32 to index
      %62 = memref.load %arg1[%61] : memref<16xi32, #tpu.memory_space<smem>>
      %63 = arith.index_cast %62 : i32 to index
      %c0_17 = arith.constant 0 : index
      %64 = vector.load %arg2[%63, %c0_17] : memref<65x128xf32, #tpu.memory_space<vmem>>, vector<1x128xf32>
      %65 = arith.index_cast %59 : i32 to index
      %c0_18 = arith.constant 0 : index
      %66 = vector.load %arg3[%65, %c0_18] : memref<16x128xf32, #tpu.memory_space<vmem>>, vector<1x128xf32>
      tpu.vector_store %arg3[%65, %c0_18], %64 {strides = array<i32>} : memref<16x128xf32, #tpu.memory_space<vmem>>, vector<1x128xf32>,
    }
    %c2_i32_0 = arith.constant 2 : i32
    return
  }
  func.func @transform_0(%arg0: i32, %arg1: memref<16xi32, #tpu.memory_space<smem>>) -> (i32, i32) {
    %c0_i32 = arith.constant 0 : i32
    %c0_i32_0 = arith.constant 0 : i32
    %c0_i32_1 = arith.constant 0 : i32
    return %c0_i32, %c0_i32_0 : i32, i32
  }
  func.func @transform_1(%arg0: i32, %arg1: memref<16xi32, #tpu.memory_space<smem>>) -> (i32, i32) {
    %c0_i32 = arith.constant 0 : i32
    %c0_i32_0 = arith.constant 0 : i32
    return %arg0, %c0_i32 : i32, i32
  }
}

</mosaic_0001>

<bundles_post_ra>
// kernel: tpu_custom_call.1
= control target key start
LH: loop header
LB: loop body
LE: loop exit
PB: predicated region body
PF: predicated region fallthrough
CT: control target
= control target key end

     0   :  { %s234_s9 = smov [#allocation3]   ;;  %s278_s0 = inlined_call_operand.hbm [shape: s32[16], index: 0, kind: input, shape index: {}]   ;;  %s279_s1 = inlined_call_operand.hbm [shape: f32[65,128], index: 1, kind: input, shape index: {}]   ;;  %s280_s2 = inlined_call_operand.hbm [shape: f32[16,128], index: 2, kind: output, shape index: {}]  }
   0x1   :  { %8 = dma.hbm_to_smem %s278_s0, 16, %s234_s9, [#allocation2] }
   0x2   :  { %224 = dma.done.wait [#allocation2], 16 }
   0x3   :  { %225 = vsyncadd [#allocation2], 4294967280 }
   0x4   :  { %10 = sfence }
   0x5   :  { %11 = vsyncpa [#allocation5], 0 }
   0x6   :  { %12 = vsyncpa [#allocation6], 0  ;;  %s235_s12 = smov [#allocation4]  }
   0x7   :  { %s18_s13 = sshll.u32 %s235_s12, 4  ;;  %s19_s13 = int_to_ptr.vmem [resolvable:$true] %s18_s13 }
   0x8   :  { %s188_s14 = scalar_lea.vmem %s19_s13, 1152  ;;  %p193_p1 = scmp.lt.s32.totalorder %s19_s13, %s19_s13 }
   0x9   :  { %p189_p0 = scmp.ne.s32.totalorder %s19_s13, %s188_s14  ;;  %p194_p2 = scmp.lt.s32.totalorder %s188_s14, %s188_s14 }
   0xb   :  { %p195_p3 = por %p194_p2, %p193_p1 }
   0xd   :  { %p196_p4 = pnand %p195_p3, %p189_p0 }
   0xf   :  { %199 = shalt.err (!%p196_p4)
}
  0x10   :  { %s236_s15 = smov 128   ;;  %s237_s16 = smov 8  }
  0x11   :  { %24 = dma.hbm_to_vmem [thread:$0]  %s279_s1, 1152, %s19_s13, [#allocation5], %s236_s15, %s236_s15, %s237_s16  }
  0x12   :  { %226 = dma.done.wait [#allocation5], 1152  }
  0x13   :  { %227 = vsyncadd [#allocation5], 4294966144  ;;  %s263_s18 = smov 0  }
  0x14 LB: > { %s144_s19 = sshll.u32 %s232_s18, 3  ;;  %s34_s18 = sadd.s32 1, %s232_s18   ;;  %s232_s18 = sphi %s263_s18, %s34_s18  }
  0x15   : > { %s37_s20 = sld [smem:[#allocation3 + %s144_s19]]  ;;  %s42_s21 = sadd.s32 1, %s144_s19 }
  0x16   : > { %s49_s22 = sadd.s32 2, %s144_s19  ;;  %s44_s23 = sld [smem:[#allocation3 + %s42_s21]] }
  0x17   : > { %s56_s24 = sadd.s32 3, %s144_s19  ;;  %s51_s25 = sld [smem:[#allocation3 + %s49_s22]] }
  0x18   : > { %s63_s26 = sadd.s32 4, %s144_s19  ;;  %s58_s27 = sld [smem:[#allocation3 + %s56_s24]] }
  0x19   : > { %s70_s1 = sadd.s32 5, %s144_s19  ;;  %s65_s28 = sld [smem:[#allocation3 + %s63_s26]] }
  0x1a   : > { %s77_s29 = sadd.s32 6, %s144_s19  ;;  %s72_s30 = sld [smem:[#allocation3 + %s70_s1]] }
  0x1b   : > { %s38_s3 = scalar_lea.vmem [#allocation4], %s37_s20  ;;  %s79_s4 = sld [smem:[#allocation3 + %s77_s29]] }
  0x1c   : > { %v39_v0 = vld [vmem:[%s38_s3] sm:$0x1]  ;;  %s84_s5 = sadd.s32 7, %s144_s19  ;;  %s40_s6 = scalar_lea.vmem [#allocation7], %s144_s19 }
  0x1d   : > { %41 = vst [vmem:[%s40_s6] sm:$0x1] %v39_v0  ;;  %s86_s7 = sld [smem:[#allocation3 + %s84_s5]]  ;;  %s45_s8 = scalar_lea.vmem [#allocation4], %s44_s23 }
  0x1e   : > { %v46_v1 = vld [vmem:[%s45_s8] sm:$0x1]  ;;  %s52_s9 = scalar_lea.vmem [#allocation4], %s51_s25  ;;  %s59_s10 = scalar_lea.vmem [#allocation4], %s58_s27 }
  0x1f   : > { %146 = vst [vmem:[%s40_s6 + $0x1] sm:$0x1] %v46_v1  ;;  %v53_v2 = vld [vmem:[%s52_s9] sm:$0x1]  ;;  %s66_s11 = scalar_lea.vmem [#allocation4], %s65_s28  ;;  %p31_p5 = scmp.ge.s32.totalorder %s34_s18, 2  }
  0x20   : > { %148 = vst [vmem:[%s40_s6 + $0x2] sm:$0x1] %v53_v2  ;;  %v60_v3 = vld [vmem:[%s59_s10] sm:$0x1]  ;;  %s73_s12 = scalar_lea.vmem [#allocation4], %s72_s30  ;;  %s238_s0 = smov (%p31_p5), [#allocation7]  }
  0x21   : > { %150 = vst [vmem:[%s40_s6 + $0x3] sm:$0x1] %v60_v3  ;;  %v67_v4 = vld [vmem:[%s66_s11] sm:$0x1]  ;;  %s80_s13 = scalar_lea.vmem [#allocation4], %s79_s4  ;;  %33 = sbr.rel (!%p31_p5) target bundleno = 20 (0x14), region = 51 }
  0x22   : > { %152 = vst [vmem:[%s40_s6 + $0x4] sm:$0x1] %v67_v4  ;;  %v74_v5 = vld [vmem:[%s73_s12] sm:$0x1]  ;;  %s96_s17 = sshll.u32 (%p31_p5), %s238_s0, 4  ;;  %s97_s17 = int_to_ptr.vmem [resolvable:$true] %s96_s17 }
  0x23   : > { %154 = vst [vmem:[%s40_s6 + $0x5] sm:$0x1] %v74_v5  ;;  %v81_v6 = vld [vmem:[%s80_s13] sm:$0x1]  ;;  %s87_s14 = scalar_lea.vmem [#allocation4], %s86_s7  ;;  %s200_s19 = scalar_lea.vmem (%p31_p5), %s97_s17, 256 }
  0x24   : > { %156 = vst [vmem:[%s40_s6 + $0x6] sm:$0x1] %v81_v6  ;;  %v88_v7 = vld [vmem:[%s87_s14] sm:$0x1]  ;;  %p201_p6 = scmp.ne.s32.totalorder (%p31_p5), %s97_s17, %s200_s19  ;;  %p205_p7 = scmp.lt.s32.totalorder (%p31_p5), %s97_s17, %s97_s17 }
  0x25   : > { %158 = vst [vmem:[%s40_s6 + $0x7] sm:$0x1] %v88_v7  ;;  %p206_p8 = scmp.lt.s32.totalorder (%p31_p5), %s200_s19, %s200_s19 }
  0x27   :  { %p207_p9 = por %p206_p8, %p205_p7 }
  0x29   :  { %p208_p10 = pnand %p207_p9, %p201_p6 }
  0x2b   :  { %211 = shalt.err (!%p208_p10)
}
  0x2c   :  { %102 = dma.vmem_to_hbm [thread:$0]  %s97_s17, 256, %s280_s2, [#allocation6], %s236_s15, %s236_s15, %s237_s16  }
  0x2d   :  { %228 = dma.done.wait [#allocation6], 256  }
  0x2e   :  { %229 = vsyncadd [#allocation6], 4294967040 }
  0x2f   :  { %106 = vsyncpa [#allocation5], 1 }
  0x30   :  { %107 = vsyncpa [#allocation6], 1 }

</bundles_post_ra>
